<compile_context>
chip_gen: v7x
topology: tpu7x:2x2x1
jax: 0.10.0
libtpu: 0.0.40
codegen_flags: <defaults>
</compile_context>

<pallas_src>
import functools

import jax
import jax.numpy as jnp
from jax.experimental import pallas as pl
from jax.experimental.pallas import tpu as pltpu

_LANE = 128


def _round_up(n, m):
    return ((n + m - 1) // m) * m


def _act_dtype():
    """bf16 activations where the VPU supports them (v6e/v7x); f32 on v5e."""
    try:
        kind = jax.devices()[0].device_kind.lower()
    except Exception:  # pragma: no cover - defensive
        kind = ""
    if "v5" in kind or "v4" in kind:
        return jnp.float32
    return jnp.bfloat16


def _classifier_kernel(z_ref, w1_ref, b1_ref, w2_ref, b2_ref, w3_ref, b3_ref,
                       out_ref, *, act_dtype):
    """Fused 3-layer MLP forward for one batch tile (all weights resident)."""
    # Layer 1: Linear(latent_dim -> 512) + LeakyReLU(0.2).
    # z is already bf16; MXU matmul with f32 accumulation, bias add in f32.
    h1 = jnp.dot(z_ref[...], w1_ref[...],
                 preferred_element_type=jnp.float32) + b1_ref[...]
    h1 = h1.astype(act_dtype)
    h1 = jnp.maximum(h1, h1 * 0.2)          # 2-op LeakyReLU (slope < 1)

    # Layer 2: Linear(512 -> 256) + LeakyReLU(0.2)
    h2 = jnp.dot(h1.astype(jnp.bfloat16), w2_ref[...],
                 preferred_element_type=jnp.float32) + b2_ref[...]
    h2 = h2.astype(act_dtype)
    h2 = jnp.maximum(h2, h2 * 0.2)

    # Layer 3: Linear(256 -> lane-padded num_classes), logits (no activation)
    logits = jnp.dot(h2.astype(jnp.bfloat16), w3_ref[...],
                     preferred_element_type=jnp.float32) + b3_ref[...]
    out_ref[...] = logits.astype(out_ref.dtype)


@functools.partial(jax.jit, static_argnames=("num_classes", "block_b"))
def classifier_forward(z, params, num_classes, block_b=1024):
    """z: [B, latent_dim] (f32 or bf16).  params: kernel-ready (bf16 weights)."""
    B, latent_dim = z.shape
    w1, b1 = params["w1"], params["b1"]
    w2, b2 = params["w2"], params["b2"]
    w3, b3 = params["w3"], params["b3"]
    assert w1.shape[0] == latent_dim, (w1.shape, latent_dim)
    n_pad = w3.shape[1]                      # lane-padded class dim (x128)
    act_dtype = _act_dtype()

    # Feed z in bf16: halves the input DMA bytes and removes the in-kernel
    # f32->bf16 cast over [tb, latent_dim].  (Ideally the producer already
    # emits bf16; then this convert is a no-op.)
    if z.dtype != jnp.bfloat16:
        z = z.astype(jnp.bfloat16)

    # Batch tiling: large tiles amortize per-step pipeline overhead and fill
    # the MXU M dimension.  Force an EVEN number of grid steps (when B allows)
    # so the "parallel" axis splits evenly across v7x's two TensorCores.
    tb = min(block_b, B)
    if B >= 16:
        steps = 2 * pl.cdiv(B, 2 * tb)       # even step count
        tb_even = _round_up(pl.cdiv(B, steps), 8)
        if tb_even <= B:
            tb = tb_even
    grid = (pl.cdiv(B, tb),)

    flops = 2 * B * (latent_dim * 512 + 512 * 256 + 256 * n_pad)
    bytes_accessed = (z.size * 2                                 # bf16 input
                      + w1.size * 2 + w2.size * 2 + w3.size * 2  # bf16 weights
                      + (b1.size + b2.size + b3.size) * 4        # f32 biases
                      + B * n_pad * 4)                           # f32 output

    resident = lambda i: (0, 0)  # constant index_map -> stays in VMEM
    out_padded = pl.pallas_call(
        functools.partial(_classifier_kernel, act_dtype=act_dtype),
        out_shape=jax.ShapeDtypeStruct((B, n_pad), jnp.float32),
        grid_spec=pltpu.PrefetchScalarGridSpec(
            num_scalar_prefetch=0,
            grid=grid,
            in_specs=[
                pl.BlockSpec((tb, latent_dim), lambda i: (i, 0)),  # z tile (bf16)
                pl.BlockSpec(w1.shape, resident),                  # w1 (bf16)
                pl.BlockSpec(b1.shape, resident),                  # b1 (f32)
                pl.BlockSpec(w2.shape, resident),                  # w2 (bf16)
                pl.BlockSpec(b2.shape, resident),                  # b2 (f32)
                pl.BlockSpec(w3.shape, resident),                  # w3 (bf16, lane-padded)
                pl.BlockSpec(b3.shape, resident),                  # b3 (f32, lane-padded)
            ],
            out_specs=pl.BlockSpec((tb, n_pad), lambda i: (i, 0)),
        ),
        compiler_params=pltpu.CompilerParams(
            dimension_semantics=("parallel",)),
        cost_estimate=pl.CostEstimate(flops=flops, transcendentals=0,
                                      bytes_accessed=bytes_accessed),
    )(z, w1, b1, w2, b2, w3, b3)

    # Keep f32 [B, num_classes] to match the PyTorch module's output contract;
    # downstream code that tolerates it can consume out_padded directly.
    return out_padded[:, :num_classes]


def init_classifier_params(key, latent_dim, num_classes=2):
    """PyTorch nn.Linear default init: U(-1/sqrt(fan_in), 1/sqrt(fan_in)).

    Weights stored [in, out] in bf16 (MXU-native), biases in f32 as [1, out].
    Only the last layer's class dim is zero-padded (to 128 lanes); the first
    layer keeps K = latent_dim so no per-call padding of z is needed.
    """
    dims = [(latent_dim, 512), (512, 256), (256, num_classes)]
    keys = jax.random.split(key, 2 * len(dims))
    params = {}
    for idx, (fan_in, fan_out) in enumerate(dims):
        bound = 1.0 / (fan_in ** 0.5)
        w = jax.random.uniform(keys[2 * idx], (fan_in, fan_out),
                               dtype=jnp.float32, minval=-bound, maxval=bound)
        b = jax.random.uniform(keys[2 * idx + 1], (1, fan_out),
                               dtype=jnp.float32, minval=-bound, maxval=bound)
        params[f"w{idx + 1}"] = w
        params[f"b{idx + 1}"] = b

    n_extra = (-num_classes) % _LANE
    if n_extra:
        params["w3"] = jnp.pad(params["w3"], ((0, 0), (0, n_extra)))
        params["b3"] = jnp.pad(params["b3"], ((0, 0), (0, n_extra)))
    for name in ("w1", "w2", "w3"):
        params[name] = params[name].astype(jnp.bfloat16)
    return params


def _reference_forward(z, params, num_classes, act_dtype):
    """Plain-JAX reference mirroring the kernel's mixed-precision math."""
    bf = jnp.bfloat16
    h = jnp.dot(z.astype(bf), params["w1"],
                preferred_element_type=jnp.float32) + params["b1"]
    h = h.astype(act_dtype)
    h = jnp.maximum(h, h * 0.2)
    h = jnp.dot(h.astype(bf), params["w2"],
                preferred_element_type=jnp.float32) + params["b2"]
    h = h.astype(act_dtype)
    h = jnp.maximum(h, h * 0.2)
    logits = jnp.dot(h.astype(bf), params["w3"],
                     preferred_element_type=jnp.float32) + params["b3"]
    return logits[:, :num_classes]


def _reference_forward_f32(z, params, num_classes):
    """Full-f32 reference (the true PyTorch-semantics model)."""
    w1 = params["w1"].astype(jnp.float32)
    w2 = params["w2"].astype(jnp.float32)
    w3 = params["w3"].astype(jnp.float32)
    h = z @ w1 + params["b1"]
    h = jnp.where(h > 0, h, 0.2 * h)
    h = h @ w2 + params["b2"]
    h = jnp.where(h > 0, h, 0.2 * h)
    logits = h @ w3 + params["b3"]
    return logits[:, :num_classes]


if __name__ == "__main__":
    key = jax.random.PRNGKey(0)
    k_param, k_data = jax.random.split(key)

    batch = 2
    latent_dim = 32
    num_classes = 2

    params = init_classifier_params(k_param, latent_dim, num_classes)
    act_dtype = _act_dtype()

    # Spec-sized case (batch=2).
    z = jax.random.normal(k_data, (batch, latent_dim), dtype=jnp.float32)
    logits = classifier_forward(z, params, num_classes=num_classes)
    jax.block_until_ready(logits)
    assert logits.shape == (batch, num_classes), logits.shape

    ref = _reference_forward(z, params, num_classes, act_dtype)
    assert jnp.allclose(logits, ref, atol=2e-3, rtol=2e-2), (
        float(jnp.max(jnp.abs(logits - ref))))
    # Sanity vs. the true f32 model (bf16 weights/inputs are an intentional
    # deviation; validate the error is small for a classifier head).
    ref32 = _reference_forward_f32(z, params, num_classes)
    assert jnp.allclose(logits, ref32, atol=5e-2, rtol=5e-2), (
        float(jnp.max(jnp.abs(logits - ref32))))

    # Multi-tile case: exercises the even-grid-step tiling and partial blocks.
    z2 = jax.random.normal(jax.random.PRNGKey(1), (40, latent_dim),
                           dtype=jnp.float32)
    logits2 = classifier_forward(z2, params, num_classes=num_classes)
    jax.block_until_ready(logits2)
    ref2 = _reference_forward(z2, params, num_classes, act_dtype)
    assert logits2.shape == (40, num_classes), logits2.shape
    assert jnp.allclose(logits2, ref2, atol=2e-3, rtol=2e-2), (
        float(jnp.max(jnp.abs(logits2 - ref2))))

    print("KERNEL_OK")
</pallas_src>

<mosaic_0001>
module attributes {stable_mosaic.version = 11 : i64} {
  func.func @_classifier_kernel(%arg0: i32, %arg1: memref<2x32xbf16, #tpu.memory_space<vmem>>, %arg2: memref<32x512xbf16, #tpu.memory_space<vmem>>, %arg3: memref<1x512xf32, #tpu.memory_space<vmem>>, %arg4: memref<512x256xbf16, #tpu.memory_space<vmem>>, %arg5: memref<1x256xf32, #tpu.memory_space<vmem>>, %arg6: memref<256x128xbf16, #tpu.memory_space<vmem>>, %arg7: memref<1x128xf32, #tpu.memory_space<vmem>>, %arg8: memref<2x128xf32, #tpu.memory_space<vmem>>) attributes {dimension_semantics = [#tpu.dimension_semantics<parallel>], iteration_bounds = array<i64: 1>, scalar_prefetch = 0 : i64, scratch_operands = 0 : i64, tpu.core_type = #tpu.core_type<tc>, window_params = [{transform_indices = @transform_0, window_bounds = array<i64: 2, 32>}, {pipeline_mode = #tpu.pipeline_mode<synchronous>, transform_indices = @transform_1, window_bounds = array<i64: 32, 512>}, {pipeline_mode = #tpu.pipeline_mode<synchronous>, transform_indices = @transform_2, window_bounds = array<i64: 1, 512>}, {pipeline_mode = #tpu.pipeline_mode<synchronous>, transform_indices = @transform_3, window_bounds = array<i64: 512, 256>}, {pipeline_mode = #tpu.pipeline_mode<synchronous>, transform_indices = @transform_4, window_bounds = array<i64: 1, 256>}, {pipeline_mode = #tpu.pipeline_mode<synchronous>, transform_indices = @transform_5, window_bounds = array<i64: 256, 128>}, {pipeline_mode = #tpu.pipeline_mode<synchronous>, transform_indices = @transform_6, window_bounds = array<i64: 1, 128>}, {transform_indices = @transform_7, window_bounds = array<i64: 2, 128>}]} {
    %c0 = arith.constant 0 : index
    %c0_0 = arith.constant 0 : index
    %0 = vector.load %arg1[%c0, %c0_0] : memref<2x32xbf16, #tpu.memory_space<vmem>>, vector<2x32xbf16>
    %c0_1 = arith.constant 0 : index
    %c0_2 = arith.constant 0 : index
    %1 = vector.load %arg2[%c0_1, %c0_2] : memref<32x512xbf16, #tpu.memory_space<vmem>>, vector<32x512xbf16>
    %cst = arith.constant dense<0.000000e+00> : vector<2x512xf32>
    %2 = tpu.matmul %0, %1, %cst {dimension_numbers = #tpu.dot_dimension_numbers<[1], [0], [0], [1], [0, 0, 1, 1], [], []>} : vector<2x32xbf16>, vector<32x512xbf16>, vector<2x512xf32> -> vector<2x512xf32>
    %c0_3 = arith.constant 0 : index
    %c0_4 = arith.constant 0 : index
    %3 = vector.load %arg3[%c0_3, %c0_4] : memref<1x512xf32, #tpu.memory_space<vmem>>, vector<1x512xf32>
    %4 = vector.broadcast %3 : vector<1x512xf32> to vector<2x512xf32>
    %5 = arith.addf %2, %4 : vector<2x512xf32>
    %6 = arith.truncf %5 : vector<2x512xf32> to vector<2x512xbf16>
    %cst_5 = arith.constant 2.001950e-01 : bf16
    %7 = vector.broadcast %cst_5 : bf16 to vector<2x512xbf16>
    %8 = arith.mulf %6, %7 : vector<2x512xbf16>
    %9 = arith.maximumf %6, %8 : vector<2x512xbf16>
    %c0_6 = arith.constant 0 : index
    %c0_7 = arith.constant 0 : index
    %10 = vector.load %arg4[%c0_6, %c0_7] : memref<512x256xbf16, #tpu.memory_space<vmem>>, vector<512x256xbf16>
    %cst_8 = arith.constant dense<0.000000e+00> : vector<2x256xf32>
    %11 = tpu.matmul %9, %10, %cst_8 {dimension_numbers = #tpu.dot_dimension_numbers<[1], [0], [0], [1], [0, 0, 1, 1], [], []>} : vector<2x512xbf16>, vector<512x256xbf16>, vector<2x256xf32> -> vector<2x256xf32>
    %c0_9 = arith.constant 0 : index
    %c0_10 = arith.constant 0 : index
    %12 = vector.load %arg5[%c0_9, %c0_10] : memref<1x256xf32, #tpu.memory_space<vmem>>, vector<1x256xf32>
    %13 = vector.broadcast %12 : vector<1x256xf32> to vector<2x256xf32>
    %14 = arith.addf %11, %13 : vector<2x256xf32>
    %15 = arith.truncf %14 : vector<2x256xf32> to vector<2x256xbf16>
    %cst_11 = arith.constant 2.001950e-01 : bf16
    %16 = vector.broadcast %cst_11 : bf16 to vector<2x256xbf16>
    %17 = arith.mulf %15, %16 : vector<2x256xbf16>
    %18 = arith.maximumf %15, %17 : vector<2x256xbf16>
    %c0_12 = arith.constant 0 : index
    %c0_13 = arith.constant 0 : index
    %19 = vector.load %arg6[%c0_12, %c0_13] : memref<256x128xbf16, #tpu.memory_space<vmem>>, vector<256x128xbf16>
    %cst_14 = arith.constant dense<0.000000e+00> : vector<2x128xf32>
    %20 = tpu.matmul %18, %19, %cst_14 {dimension_numbers = #tpu.dot_dimension_numbers<[1], [0], [0], [1], [0, 0, 1, 1], [], []>} : vector<2x256xbf16>, vector<256x128xbf16>, vector<2x128xf32> -> vector<2x128xf32>
    %c0_15 = arith.constant 0 : index
    %c0_16 = arith.constant 0 : index
    %21 = vector.load %arg7[%c0_15, %c0_16] : memref<1x128xf32, #tpu.memory_space<vmem>>, vector<1x128xf32>
    %22 = vector.broadcast %21 : vector<1x128xf32> to vector<2x128xf32>
    %23 = arith.addf %20, %22 : vector<2x128xf32>
    %c0_17 = arith.constant 0 : index
    %c0_18 = arith.constant 0 : index
    %24 = vector.load %arg8[%c0_17, %c0_18] : memref<2x128xf32, #tpu.memory_space<vmem>>, vector<2x128xf32>
    tpu.vector_store %arg8[%c0_17, %c0_18], %23 {strides = array<i32>} : memref<2x128xf32, #tpu.memory_space<vmem>>, vector<2x128xf32>,
    return
  }
  func.func @transform_0(%arg0: i32) -> (i32, i32) {
    %c0_i32 = arith.constant 0 : i32
    %c0_i32_0 = arith.constant 0 : i32
    return %arg0, %c0_i32 : i32, i32
  }
  func.func @transform_1(%arg0: i32) -> (i32, i32) {
    %c0_i32 = arith.constant 0 : i32
    %c0_i32_0 = arith.constant 0 : i32
    %c0_i32_1 = arith.constant 0 : i32
    return %c0_i32, %c0_i32_0 : i32, i32
  }
  func.func @transform_2(%arg0: i32) -> (i32, i32) {
    %c0_i32 = arith.constant 0 : i32
    %c0_i32_0 = arith.constant 0 : i32
    %c0_i32_1 = arith.constant 0 : i32
    return %c0_i32, %c0_i32_0 : i32, i32
  }
  func.func @transform_3(%arg0: i32) -> (i32, i32) {
    %c0_i32 = arith.constant 0 : i32
    %c0_i32_0 = arith.constant 0 : i32
    %c0_i32_1 = arith.constant 0 : i32
    return %c0_i32, %c0_i32_0 : i32, i32
  }
  func.func @transform_4(%arg0: i32) -> (i32, i32) {
    %c0_i32 = arith.constant 0 : i32
    %c0_i32_0 = arith.constant 0 : i32
    %c0_i32_1 = arith.constant 0 : i32
    return %c0_i32, %c0_i32_0 : i32, i32
  }
  func.func @transform_5(%arg0: i32) -> (i32, i32) {
    %c0_i32 = arith.constant 0 : i32
    %c0_i32_0 = arith.constant 0 : i32
    %c0_i32_1 = arith.constant 0 : i32
    return %c0_i32, %c0_i32_0 : i32, i32
  }
  func.func @transform_6(%arg0: i32) -> (i32, i32) {
    %c0_i32 = arith.constant 0 : i32
    %c0_i32_0 = arith.constant 0 : i32
    %c0_i32_1 = arith.constant 0 : i32
    return %c0_i32, %c0_i32_0 : i32, i32
  }
  func.func @transform_7(%arg0: i32) -> (i32, i32) {
    %c0_i32 = arith.constant 0 : i32
    %c0_i32_0 = arith.constant 0 : i32
    return %arg0, %c0_i32 : i32, i32
  }
}

</mosaic_0001>

<bundles_post_ra>
// kernel: classifier_forward.1
= control target key start
LH: loop header
LB: loop body
LE: loop exit
PB: predicated region body
PF: predicated region fallthrough
CT: control target
= control target key end

     0   :  { %12 = vsyncpa [#allocation3], 0  ;;  %s1388_s0 = inlined_call_operand.vmem [shape: bf16[2,32], index: 0, kind: input, shape index: {}]   ;;  %s1389_s1 = inlined_call_operand.hbm [shape: bf16[32,512], index: 1, kind: input, shape index: {}]   ;;  %s1390_s2 = inlined_call_operand.vmem [shape: f32[1,512], index: 2, kind: input, shape index: {}]   ;;  %s1391_s3 = inlined_call_operand.hbm [shape: bf16[512,256], index: 3, kind: input, shape index: {}]   ;;  %s1392_s4 = inlined_call_operand.vmem [shape: f32[1,256], index: 4, kind: input, shape index: {}]   ;;  %s1393_s5 = inlined_call_operand.hbm [shape: bf16[256,128], index: 5, kind: input, shape index: {}]   ;;  %s1394_s6 = inlined_call_operand.vmem [shape: f32[1,128], index: 6, kind: input, shape index: {}]   ;;  %s1395_s7 = inlined_call_operand.hbm [shape: f32[2,128], index: 7, kind: output, shape index: {}]  }
   0x1   :  { %13 = vsyncpa [#allocation6], 0 }
   0x2   :  { %14 = vsyncpa [#allocation4], 0  ;;  %s1261_s24 = smov [#allocation5]   ;;  %s1167_s28 = scalar_lea.hbm %s1391_s3, 8192 }
   0x3   :  { %s36_s25 = sshll.u32 %s1261_s24, 4  ;;  %p1168_p0 = scmp.ne.s32.totalorder %s1391_s3, %s1167_s28  ;;  %s37_s25 = int_to_ptr.vmem [resolvable:$true] %s36_s25 }
   0x4   :  { %p1171_p1 = scmp.lt.u32.totalorder %s1167_s28, %s1391_s3 }
   0x6   :  { %p1173_p2 = pnand %p1171_p1, %p1168_p0 }
   0x8   :  { %1176 = shalt.err (!%p1173_p2)
}
   0x9   :  { %s1177_s10 = scalar_lea.vmem %s37_s25, 8192  ;;  %p1182_p4 = scmp.lt.s32.totalorder %s37_s25, %s37_s25 }
   0xa   :  { %p1178_p3 = scmp.ne.s32.totalorder %s37_s25, %s1177_s10  ;;  %p1183_p5 = scmp.lt.s32.totalorder %s1177_s10, %s1177_s10 }
   0xc   :  { %p1184_p6 = por %p1183_p5, %p1182_p4 }
   0xe   :  { %p1185_p7 = pnand %p1184_p6, %p1178_p3 }
  0x10   :  { %1188 = shalt.err (!%p1185_p7)
}
  0x11   :  { %s1262_s11 = smov 128   ;;  %s1263_s12 = smov 8  }
  0x12   :  { %42 = dma.hbm_to_vmem [thread:$0]  %s1391_s3, 8192, %s37_s25, [#allocation6], %s1262_s11, %s1262_s11, %s1263_s12  }
  0x13   :  { %s1264_s15 = smov [#allocation2]   ;;  %s1189_s19 = scalar_lea.hbm %s1389_s1, 1024 }
  0x14   :  { %s22_s16 = sshll.u32 %s1264_s15, 4  ;;  %p1190_p8 = scmp.ne.s32.totalorder %s1389_s1, %s1189_s19  ;;  %s23_s16 = int_to_ptr.vmem [resolvable:$true] %s22_s16 }
  0x15   :  { %p1193_p9 = scmp.lt.u32.totalorder %s1189_s19, %s1389_s1 }
  0x17   :  { %p1195_p10 = pnand %p1193_p9, %p1190_p8 }
  0x19   :  { %1198 = shalt.err (!%p1195_p10)
}
  0x1a   :  { %s1199_s24 = scalar_lea.vmem %s23_s16, 1024  ;;  %p1204_p12 = scmp.lt.s32.totalorder %s23_s16, %s23_s16 }
  0x1b   :  { %p1200_p11 = scmp.ne.s32.totalorder %s23_s16, %s1199_s24  ;;  %p1205_p13 = scmp.lt.s32.totalorder %s1199_s24, %s1199_s24 }
  0x1d   :  { %p1206_p0 = por %p1205_p13, %p1204_p12 }
  0x1f   :  { %p1207_p1 = pnand %p1206_p0, %p1200_p11 }
  0x21   :  { %1210 = shalt.err (!%p1207_p1)
}
  0x22   :  { %s1265_s3 = smov 256   ;;  %s1266_s25 = smov 16  }
  0x23   :  { %28 = dma.hbm_to_vmem [thread:$0]  %s1389_s1, 1024, %s23_s16, [#allocation3], %s1265_s3, %s1265_s3, %s1266_s25  }
  0x24   :  { %s1267_s28 = smov [#allocation7]   ;;  %s1211_s9 = scalar_lea.hbm %s1393_s5, 2048 }
  0x25   :  { %s50_s29 = sshll.u32 %s1267_s28, 4  ;;  %p1212_p2 = scmp.ne.s32.totalorder %s1393_s5, %s1211_s9  ;;  %s51_s29 = int_to_ptr.vmem [resolvable:$true] %s50_s29 }
  0x26   :  { %p1215_p3 = scmp.lt.u32.totalorder %s1211_s9, %s1393_s5 }
  0x28   :  { %p1217_p4 = pnand %p1215_p3, %p1212_p2 }
  0x2a   :  { %1220 = shalt.err (!%p1217_p4)
}
  0x2b   :  { %s1221_s14 = scalar_lea.vmem %s51_s29, 2048  ;;  %p1226_p6 = scmp.lt.s32.totalorder %s51_s29, %s51_s29 }
  0x2c   :  { %p1222_p5 = scmp.ne.s32.totalorder %s51_s29, %s1221_s14  ;;  %p1227_p7 = scmp.lt.s32.totalorder %s1221_s14, %s1221_s14 }
  0x2e   :  { %p1228_p8 = por %p1227_p7, %p1226_p6 }
  0x30   :  { %p1229_p9 = pnand %p1228_p8, %p1222_p5 }
  0x32   :  { %1232 = shalt.err (!%p1229_p9)
}
  0x33   :  { %s1268_s1 = smov 64   ;;  %s1269_s15 = smov 4  }
  0x34   :  { %56 = dma.hbm_to_vmem [thread:$0]  %s1393_s5, 2048, %s51_s29, [#allocation6], %s1268_s1, %s1268_s1, %s1269_s15  }
  0x35   :  { %1255 = dma.done.wait [#allocation3], 1024  }
  0x36   :  { %1256 = vsyncadd [#allocation3], 4294966272 }
  0x37   :  { %1257 = dma.done.wait [#allocation6], 10240  }
  0x38   :  { %1258 = vsyncadd [#allocation6], 4294957056  ;;  %v1270_v0 = vmov 0   ;;  %v1043_v1 = vld [vmem:[#allocation2 + $0x4] ss:$16 sps:$4 sm:$0xff]   ;;  %vm141_vm0 = vcmask 261120  }
  0x39   :  { %177 = vmatprep.mubr.bf16.mxu0 %v1270_v0  ;;  %v1045_v2 = vld [vmem:[#allocation2] ss:$16 sps:$4 sm:$0xff]   ;;  %145 = vmatprep.subr.bf16.mxu0 %v1043_v1  ;;  %v1046_v3 = vld [vmem:[#allocation2 + $0x24] ss:$16 sps:$4 sm:$0xff]   ;;  %v1051_v5 = vld [vmem:[#allocation2 + $0xc] ss:$16 sps:$4 sm:$0xff]  }
  0x3a   :  { %146 = vmatpush1.bf16.msra.mxu0 %v1045_v2  ;;  %v1048_v4 = vld [vmem:[#allocation2 + $0x20] ss:$16 sps:$4 sm:$0xff]   ;;  %v1049_v7 = vld [vmem:[#allocation2 + $0x8] ss:$16 sps:$4 sm:$0xff]   ;;  %v1055_v8 = vld [vmem:[#allocation5 + $0x4] ss:$8 sps:$4 sm:$0xff]  }
  0x3b   :  { %147 = vmatprep.subr.bf16.mxu0 %v1046_v3  ;;  %v70_v6 = vld [vmem:[%s1388_s0] sm:$0x1]  ;;  %v1058_v10 = vld [vmem:[#allocation5 + $0x14] ss:$8 sps:$4 sm:$0xff]   ;;  %635 = vmatprep.subr.bf16.mxu1 %v1055_v8  ;;  %v1060_v12 = vld [vmem:[#allocation5 + $0x10] ss:$8 sps:$4 sm:$0xff]  }
  0x3c   :  { %v1057_v9 = vld [vmem:[#allocation5] ss:$8 sps:$4 sm:$0xff]   ;;  %v1054_v11 = vld [vmem:[#allocation2 + $0x2c] ss:$16 sps:$4 sm:$0xff]   ;;  %v1072_v20 = vld [vmem:[#allocation5 + $0x30] ss:$8 sps:$4 sm:$0xff]  }
  0x3d   :  { %636 = vmatpush1.bf16.msra.mxu1 %v1057_v9  ;;  %v1061_v13 = vld [vmem:[#allocation5 + $0x24] ss:$8 sps:$4 sm:$0xff]   ;;  %v1052_v14 = vld [vmem:[#allocation2 + $0x28] ss:$16 sps:$4 sm:$0xff]   ;;  %v1067_v17 = vld [vmem:[#allocation5 + $0x34] ss:$8 sps:$4 sm:$0xff]  }
  0x3e   :  { %148 = vmatpush1.bf16.msra.mxu0 %v1048_v4  ;;  %637 = vmatprep.subr.bf16.mxu1 %v1058_v10  ;;  %v1065_v15 = vld [vmem:[#allocation5 + $0x104] ss:$8 sps:$4 sm:$0xff]   ;;  %v1066_v16 = vld [vmem:[#allocation5 + $0x20] ss:$8 sps:$4 sm:$0xff]   ;;  %v1071_v19 = vld [vmem:[#allocation5 + $0x114] ss:$8 sps:$4 sm:$0xff]  }
  0x3f   :  { %186 = vmatprep.subr.bf16.mxu0 %v1051_v5  ;;  %v1063_v18 = vld [vmem:[#allocation5 + $0x100] ss:$8 sps:$4 sm:$0xff]   ;;  %v1073_v21 = vld [vmem:[#allocation5 + $0x44] ss:$8 sps:$4 sm:$0xff]   ;;  %v1069_v22 = vld [vmem:[#allocation5 + $0x110] ss:$8 sps:$4 sm:$0xff]  }
  0x40   :  { %v1077_v23 = vld [vmem:[#allocation5 + $0x124] ss:$8 sps:$4 sm:$0xff]   ;;  %v1078_v24 = vld [vmem:[#allocation5 + $0x40] ss:$8 sps:$4 sm:$0xff]   ;;  %v1079_v25 = vld [vmem:[#allocation5 + $0x54] ss:$8 sps:$4 sm:$0xff]  }
  0x41   :  { %923 = vmatmul.mubr.msk.bf16.vlgmr.msra.gmra.mrb[0].mxu0 %vm141_vm0, %v70_v6  ;;  %638 = vmatpush1.bf16.msra.mxu1 %v1060_v12  ;;  %v1075_v26 = vld [vmem:[#allocation5 + $0x120] ss:$8 sps:$4 sm:$0xff]   ;;  %v1083_v27 = vld [vmem:[#allocation5 + $0x134] ss:$8 sps:$4 sm:$0xff]   ;;  %v1084_v28 = vld [vmem:[#allocation5 + $0x50] ss:$8 sps:$4 sm:$0xff]  }
  0x42   :  { %187 = vmatpush1.bf16.msra.mxu0 %v1049_v7  ;;  %218 = vmatprep.mubr.bf16.mxu0 %v1270_v0  ;;  %v1085_v29 = vld [vmem:[#allocation5 + $0x64] ss:$8 sps:$4 sm:$0xff]   ;;  %v1081_v30 = vld [vmem:[#allocation5 + $0x130] ss:$8 sps:$4 sm:$0xff]   ;;  %v1090_v32 = vld [vmem:[#allocation5 + $0x60] ss:$8 sps:$4 sm:$0xff]  }
  0x43   :  { %188 = vmatprep.subr.bf16.mxu0 %v1054_v11  ;;  %639 = vmatprep.subr.bf16.mxu1 %v1061_v13  ;;  %v1089_v31 = vld [vmem:[#allocation5 + $0x144] ss:$8 sps:$4 sm:$0xff]   ;;  %v1091_v33 = vld [vmem:[#allocation5 + $0x74] ss:$8 sps:$4 sm:$0xff]   ;;  %v1087_v34 = vld [vmem:[#allocation5 + $0x140] ss:$8 sps:$4 sm:$0xff]   ;;  %v81_v11 = vlaneseq }
  0x44   :  { %v1095_v35 = vld [vmem:[#allocation5 + $0x154] ss:$8 sps:$4 sm:$0xff]   ;;  %v1096_v36 = vld [vmem:[#allocation5 + $0x70] ss:$8 sps:$4 sm:$0xff]   ;;  %v1097_v37 = vld [vmem:[#allocation5 + $0x84] ss:$8 sps:$4 sm:$0xff]  }
  0x45   :  { %640 = vmatpush1.bf16.msra.mxu1 %v1066_v16  ;;  %v1093_v38 = vld [vmem:[#allocation5 + $0x150] ss:$8 sps:$4 sm:$0xff]   ;;  %v1101_v39 = vld [vmem:[#allocation5 + $0x164] ss:$8 sps:$4 sm:$0xff]   ;;  %v1099_v40 = vld [vmem:[#allocation5 + $0x160] ss:$8 sps:$4 sm:$0xff]  }
  0x46   :  { %189 = vmatpush1.bf16.msra.mxu0 %v1052_v14  ;;  %641 = vmatprep.subr.bf16.mxu1 %v1067_v17  ;;  %v1102_v41 = vld [vmem:[#allocation5 + $0x80] ss:$8 sps:$4 sm:$0xff]   ;;  %v1103_v42 = vld [vmem:[#allocation5 + $0x94] ss:$8 sps:$4 sm:$0xff]   ;;  %v1108_v44 = vld [vmem:[#allocation5 + $0x90] ss:$8 sps:$4 sm:$0xff]  }
  0x47   :  { %676 = vmatprep.subr.bf16.mxu0 %v1065_v15  ;;  %v1107_v43 = vld [vmem:[#allocation5 + $0x174] ss:$8 sps:$4 sm:$0xff]   ;;  %v1109_v45 = vld [vmem:[#allocation5 + $0xa4] ss:$8 sps:$4 sm:$0xff]   ;;  %v1105_v46 = vld [vmem:[#allocation5 + $0x170] ss:$8 sps:$4 sm:$0xff]  }
  0x48   :  { %v1113_v47 = vld [vmem:[#allocation5 + $0x184] ss:$8 sps:$4 sm:$0xff]   ;;  %v1114_v48 = vld [vmem:[#allocation5 + $0xa0] ss:$8 sps:$4 sm:$0xff]   ;;  %v1115_v49 = vld [vmem:[#allocation5 + $0xb4] ss:$8 sps:$4 sm:$0xff]  }
  0x49   :  { %924 = vmatmul.mubr.msk.bf16.vlgmr.msra.gmra.mrb[4].mxu0 %vm141_vm0, %v70_v6  ;;  %642 = vmatpush1.bf16.msra.mxu1 %v1072_v20  ;;  %v1111_v50 = vld [vmem:[#allocation5 + $0x180] ss:$8 sps:$4 sm:$0xff]   ;;  %v1119_v51 = vld [vmem:[#allocation5 + $0x194] ss:$8 sps:$4 sm:$0xff]   ;;  %v1120_v52 = vld [vmem:[#allocation5 + $0xb0] ss:$8 sps:$4 sm:$0xff]  }
  0x4a   :  { %677 = vmatpush1.bf16.msra.mxu0 %v1063_v18  ;;  %643 = vmatprep.subr.bf16.mxu1 %v1073_v21  ;;  %v1121_v53 = vld [vmem:[#allocation5 + $0xc4] ss:$8 sps:$4 sm:$0xff]   ;;  %v1117_v54 = vld [vmem:[#allocation5 + $0x190] ss:$8 sps:$4 sm:$0xff]   ;;  %v1126_v56 = vld [vmem:[#allocation5 + $0xc0] ss:$8 sps:$4 sm:$0xff]  }
  0x4b   :  { %678 = vmatprep.subr.bf16.mxu0 %v1071_v19  ;;  %v1125_v55 = vld [vmem:[#allocation5 + $0x1a4] ss:$8 sps:$4 sm:$0xff]   ;;  %v1127_v57 = vld [vmem:[#allocation5 + $0xd4] ss:$8 sps:$4 sm:$0xff]   ;;  %v1123_v58 = vld [vmem:[#allocation5 + $0x1a0] ss:$8 sps:$4 sm:$0xff]  }
  0x4c   :  { %v1131_v59 = vld [vmem:[#allocation5 + $0x1b4] ss:$8 sps:$4 sm:$0xff]   ;;  %v1129_v60 = vld [vmem:[#allocation5 + $0x1b0] ss:$8 sps:$4 sm:$0xff]   ;;  %v1133_v62 = vld [vmem:[#allocation5 + $0xe4] ss:$8 sps:$4 sm:$0xff]  }
  0x4d   :  { %644 = vmatpush1.bf16.msra.mxu1 %v1078_v24  ;;  %v1132_v61 = vld [vmem:[#allocation5 + $0xd0] ss:$8 sps:$4 sm:$0xff]   ;;  %v1137_v63 = vld [vmem:[#allocation5 + $0x1c4] ss:$8 sps:$4 sm:$0xff]   ;;  %v1135_v0 = vld [vmem:[#allocation5 + $0x1c0] ss:$8 sps:$4 sm:$0xff]  }
  0x4e   :  { %679 = vmatpush1.bf16.msra.mxu0 %v1069_v22  ;;  %645 = vmatprep.subr.bf16.mxu1 %v1079_v25  ;;  %v1138_v1 = vld [vmem:[#allocation5 + $0xe0] ss:$8 sps:$4 sm:$0xff]   ;;  %v1139_v2 = vld [vmem:[#allocation5 + $0xf4] ss:$8 sps:$4 sm:$0xff]   ;;  %v1141_v4 = vld [vmem:[#allocation5 + $0x1d0] ss:$8 sps:$4 sm:$0xff]  }
  0x4f   :  { %680 = vmatprep.subr.bf16.mxu0 %v1077_v23  ;;  %v1143_v3 = vld [vmem:[#allocation5 + $0x1d4] ss:$8 sps:$4 sm:$0xff]   ;;  %v1144_v5 = vld [vmem:[#allocation5 + $0xf0] ss:$8 sps:$4 sm:$0xff]   ;;  %v1147_v6 = vld [vmem:[#allocation5 + $0x1e4] ss:$8 sps:$4 sm:$0xff]  }
  0x50   :  { %v1145_v7 = vld [vmem:[#allocation5 + $0x1e0] ss:$8 sps:$4 sm:$0xff]   ;;  %v1150_v8 = vld [vmem:[#allocation5 + $0x1f4] ss:$8 sps:$4 sm:$0xff]   ;;  %v1148_v9 = vld [vmem:[#allocation5 + $0x1f0] ss:$8 sps:$4 sm:$0xff]  }
  0x51   :  { %646 = vmatpush1.bf16.msra.mxu1 %v1084_v28  ;;  %v1151_v10 = vld [vmem:[#allocation7 + $0x40] sm:$0xff]   ;;  %v1353_v12 = vshrl.u32 %v81_v11, 7  ;;  %s1271_s22 = smov [#allocation8]  }
  0x52   :  { %681 = vmatpush1.bf16.msra.mxu0 %v1075_v26  ;;  %647 = vmatprep.subr.bf16.mxu1 %v1085_v29  ;;  %v79_v14 = vld [vmem:[%s1390_s2] sm:$0xf]  ;;  %s905_s23 = sshll.u32 %s1271_s22, 4  ;;  %s906_s23 = int_to_ptr.vmem [resolvable:$true] %s905_s23 }
  0x53   :  { %682 = vmatprep.subr.bf16.mxu0 %v1083_v27  ;;  %v83_v13 = vsub.s32 0, %v1353_v12  ;;  %v87_v15 = vsub.s32 1, %v1353_v12  ;;  %v91_v21 = vsub.s32 2, %v1353_v12  ;;  %v95_v24 = vsub.s32 3, %v1353_v12  ;;  %v989_v12 = vld [vmem:[%s1394_s6] ss:$0 sm:$0xff]  ;;  %p1238_p11 = scmp.lt.s32.totalorder %s906_s23, %s906_s23 }
  0x54   :  { %s1233_s24 = scalar_lea.vmem %s906_s23, 32 }
  0x55   :  { %648 = vmatpush1.bf16.msra.mxu1 %v1090_v32  ;;  %v84_v16 = vrot.slane %v79_v14, %v83_v13  ;;  %v88_v17 = vrot.slane %v79_v14, %v87_v15  ;;  %v92_v29 = vrot.slane %v79_v14, %v91_v21  ;;  %p1234_p10 = scmp.ne.s32.totalorder %s906_s23, %s1233_s24  ;;  %p1239_p12 = scmp.lt.s32.totalorder %s1233_s24, %s1233_s24 }
  0x56   :  { %683 = vmatpush1.bf16.msra.mxu0 %v1081_v30  ;;  %649 = vmatprep.subr.bf16.mxu1 %v1091_v33  ;;  %v96_v30 = vrot.slane %v79_v14, %v95_v24 }
  0x57   :  { %684 = vmatprep.subr.bf16.mxu0 %v1089_v31  ;;  %p1240_p13 = por %p1239_p12, %p1238_p11 }
  0x59   :  { %650 = vmatpush1.bf16.msra.mxu1 %v1096_v36  ;;  %p1241_p0 = pnand %p1240_p13, %p1234_p10 }
  0x5a   :  { %685 = vmatpush1.bf16.msra.mxu0 %v1087_v34  ;;  %651 = vmatprep.subr.bf16.mxu1 %v1097_v37  ;;  %v1152_v34 = vld [vmem:[#allocation7] sm:$0xff]  }
  0x5b   :  { %686 = vmatprep.subr.bf16.mxu0 %v1095_v35 }
  0x5d   :  { %652 = vmatpush1.bf16.msra.mxu1 %v1102_v41 }
  0x5e   :  { %687 = vmatpush1.bf16.msra.mxu0 %v1093_v38  ;;  %653 = vmatprep.subr.bf16.mxu1 %v1103_v42  ;;  %v1153_v38 = vld [vmem:[#allocation7 + $0x48] sm:$0xff]  }
  0x5f   :  { %688 = vmatprep.subr.bf16.mxu0 %v1101_v39 }
  0x61   :  { %654 = vmatpush1.bf16.msra.mxu1 %v1108_v44  ;;  %v1154_v44 = vld [vmem:[#allocation7 + $0x8] sm:$0xff]  }
  0x62   :  { %689 = vmatpush1.bf16.msra.mxu0 %v1099_v40  ;;  %655 = vmatprep.subr.bf16.mxu1 %v1109_v45 }
  0x63   :  { %690 = vmatprep.subr.bf16.mxu0 %v1107_v43 }
  0x65   :  { %656 = vmatpush1.bf16.msra.mxu1 %v1114_v48 }
  0x66   :  { %691 = vmatpush1.bf16.msra.mxu0 %v1105_v46  ;;  %657 = vmatprep.subr.bf16.mxu1 %v1115_v49  ;;  %v1155_v46 = vld [vmem:[#allocation7 + $0x50] sm:$0xff]  }
  0x67   :  { %692 = vmatprep.subr.bf16.mxu0 %v1113_v47  ;;  %v1156_v49 = vld [vmem:[#allocation7 + $0x10] sm:$0xff]  }
  0x69   :  { %658 = vmatpush1.bf16.msra.mxu1 %v1120_v52  ;;  %v1158_v52 = vld [vmem:[#allocation7 + $0x18] sm:$0xff]  }
  0x6a   :  { %693 = vmatpush1.bf16.msra.mxu0 %v1111_v50  ;;  %659 = vmatprep.subr.bf16.mxu1 %v1121_v53  ;;  %v1159_v53 = vld [vmem:[#allocation7 + $0x60] sm:$0xff]  }
  0x6b   :  { %694 = vmatprep.subr.bf16.mxu0 %v1119_v51  ;;  %v1157_v51 = vld [vmem:[#allocation7 + $0x58] sm:$0xff]  }
  0x6d   :  { %660 = vmatpush1.bf16.msra.mxu1 %v1126_v56  ;;  %v1162_v56 = vld [vmem:[#allocation7 + $0x28] sm:$0xff]  }
  0x6e   :  { %695 = vmatpush1.bf16.msra.mxu0 %v1117_v54  ;;  %661 = vmatprep.subr.bf16.mxu1 %v1127_v57  ;;  %v1160_v54 = vld [vmem:[#allocation7 + $0x20] sm:$0xff]   ;;  %v1163_v57 = vld [vmem:[#allocation7 + $0x70] sm:$0xff]  }
  0x6f   :  { %696 = vmatprep.subr.bf16.mxu0 %v1125_v55  ;;  %v1161_v55 = vld [vmem:[#allocation7 + $0x68] sm:$0xff]  }
  0x71   :  { %662 = vmatpush1.bf16.msra.mxu1 %v1132_v61  ;;  %v303_v61 = vld [vmem:[%s1392_s4] sm:$0x3] }
  0x72   :  { %697 = vmatpush1.bf16.msra.mxu0 %v1123_v58  ;;  %663 = vmatprep.subr.bf16.mxu1 %v1133_v62  ;;  %v1164_v58 = vld [vmem:[#allocation7 + $0x30] sm:$0xff]  }
  0x73   :  { %698 = vmatprep.subr.bf16.mxu0 %v1131_v59  ;;  %v1165_v59 = vld [vmem:[#allocation7 + $0x78] sm:$0xff]  }
  0x75   :  { %664 = vmatpush1.bf16.msra.mxu1 %v1138_v1  ;;  %v308_v1 = vrot.slane %v303_v61, %v83_v13 }
  0x76   :  { %699 = vmatpush1.bf16.msra.mxu0 %v1129_v60  ;;  %665 = vmatprep.subr.bf16.mxu1 %v1139_v2  ;;  %v1166_v60 = vld [vmem:[#allocation7 + $0x38] sm:$0xff]  }
  0x77   :  { %700 = vmatprep.subr.bf16.mxu0 %v1137_v63 }
  0x79   :  { %666 = vmatpush1.bf16.msra.mxu1 %v1144_v5 }
  0x7a   :  { %701 = vmatpush1.bf16.msra.mxu0 %v1135_v0  ;;  %1006 = vmatprep.subr.bf16.mxu1 %v1151_v10 }
  0x7b   :  { %702 = vmatprep.subr.bf16.mxu0 %v1143_v3  ;;  %v312_v3 = vrot.slane %v303_v61, %v87_v15 }
  0x7e   :  { %703 = vmatpush1.bf16.msra.mxu0 %v1141_v4 }
  0x7f   :  { %704 = vmatprep.subr.bf16.mxu0 %v1147_v6 }
  0x82   :  { %705 = vmatpush1.bf16.msra.mxu0 %v1145_v7 }
  0x83   :  { %706 = vmatprep.subr.bf16.mxu0 %v1150_v8 }
  0x86   :  { %707 = vmatpush1.bf16.msra.mxu0 %v1148_v9 }
 0x114   :  { %v179_v18 = vpop.f32.mrb[0].mxu0 }
 0x115   :  { %v180_v19 = vadd.f32 %v179_v18, %v84_v16  ;;  %v181_v20 = vpop.f32.mrb[1].mxu0 }
 0x116   :  { %v182_v22 = vadd.f32 %v181_v20, %v88_v17  ;;  %v183_v23 = vpop.f32.mrb[2].mxu0 }
 0x117   :  { %v227_v25 = vpack.c.bf16 %v180_v19, %v180_v19  ;;  %v184_v26 = vpop.f32.mrb[3].mxu0 }
 0x118   :  { %v228_v27 = vpack.c.bf16 %v182_v22, %v182_v22 }
 0x119   :  { %v231_v28 = vmul.bf16 1045249613, %v227_v25 }
 0x11a   :  { %v232_v31 = vmul.bf16 1045249613, %v228_v27 }
 0x11b   :  { %v235_v35 = vmax.bf16 %v231_v28, %v227_v25 }
 0x11c   :  { %v220_v32 = vpop.f32.mrb[4].mxu0  ;;  %v236_v33 = vmax.bf16 %v232_v31, %v228_v27 }
 0x11d   :  { %v221_v36 = vadd.f32 %v220_v32, %v92_v29  ;;  %v222_v37 = vpop.f32.mrb[5].mxu0 }
 0x11e   :  { %v223_v39 = vadd.f32 %v222_v37, %v96_v30  ;;  %v224_v40 = vpop.f32.mrb[6].mxu0  ;;  %667 = vmatprep.mubr.bf16.mxu1 %v236_v33 }
 0x11f   :  { %v229_v41 = vpack.c.bf16 %v221_v36, %v221_v36  ;;  %v225_v42 = vpop.f32.mrb[7].mxu0  ;;  %668 = vmatmul.mubr.bf16.vlgmr.msra.gmra.mrb[0].mxu1 %v235_v35 }
 0x120   :  { %v230_v43 = vpack.c.bf16 %v223_v39, %v223_v39  ;;  %1007 = vmatpush3.bf16.msra.mxu1 %v1152_v34 }
 0x121   :  { %v233_v45 = vmul.bf16 1045249613, %v229_v41  ;;  %1008 = vmatprep.subr.bf16.mxu1 %v1153_v38 }
 0x122   :  { %v234_v47 = vmul.bf16 1045249613, %v230_v43 }
 0x123   :  { %v237_v50 = vmax.bf16 %v233_v45, %v229_v41 }
 0x124   :  { %v238_v48 = vmax.bf16 %v234_v47, %v230_v43  ;;  %1009 = vmatpush3.bf16.msra.mxu1 %v1154_v44 }
 0x125   :  { %1010 = vmatprep.subr.bf16.mxu1 %v1155_v46 }
 0x126   :  { %708 = vmatprep.mubr.bf16.mxu0 %v238_v48 }
 0x127   :  { %709 = vmatmul.mubr.bf16.vlgmr.msra.gmra.mrb[8].mxu0 %v237_v50 }
 0x128   :  { %1011 = vmatpush3.bf16.msra.mxu1 %v1156_v49 }
 0x129   :  { %1012 = vmatprep.subr.bf16.mxu1 %v1157_v51 }
 0x12c   :  { %1013 = vmatpush3.bf16.msra.mxu1 %v1158_v52 }
 0x12d   :  { %1014 = vmatprep.subr.bf16.mxu1 %v1159_v53 }
 0x130   :  { %1015 = vmatpush3.bf16.msra.mxu1 %v1160_v54 }
 0x131   :  { %1016 = vmatprep.subr.bf16.mxu1 %v1161_v55 }
 0x134   :  { %1017 = vmatpush3.bf16.msra.mxu1 %v1162_v56 }
 0x135   :  { %1018 = vmatprep.subr.bf16.mxu1 %v1163_v57 }
 0x138   :  { %1019 = vmatpush3.bf16.msra.mxu1 %v1164_v58 }
 0x139   :  { %1020 = vmatprep.subr.bf16.mxu1 %v1165_v59 }
 0x13c   :  { %1021 = vmatpush3.bf16.msra.mxu1 %v1166_v60 }
 0x1f2   :  { %v669_v62 = vpop.f32.mrb[0].mxu1 }
 0x1f3   :  { %v671_v63 = vpop.f32.mrb[1].mxu1  ;;  %v670_v4 = vadd.f32 %v669_v62, %v308_v1 }
 0x1f4   :  { %v673_v0 = vpop.f32.mrb[2].mxu1  ;;  %v672_v5 = vadd.f32 %v671_v63, %v312_v3 }
 0x1f5   :  { %v674_v2 = vpop.f32.mrb[3].mxu1 }
 0x1fa   :  { %v710_v6 = vpop.f32.mrb[8].mxu0 }
 0x1fb   :  { %v711_v7 = vadd.f32 %v710_v6, %v670_v4  ;;  %v712_v8 = vpop.f32.mrb[9].mxu0 }
 0x1fc   :  { %v713_v9 = vadd.f32 %v712_v8, %v672_v5  ;;  %v714_v10 = vpop.f32.mrb[10].mxu0 }
 0x1fd   :  { %v717_v11 = vpack.c.bf16 %v711_v7, %v711_v7  ;;  %v715_v14 = vpop.f32.mrb[11].mxu0 }
 0x1fe   :  { %v718_v16 = vpack.c.bf16 %v713_v9, %v713_v9 }
 0x1ff   :  { %v719_v17 = vmul.bf16 1045249613, %v717_v11 }
 0x200   :  { %v720_v18 = vmul.bf16 1045249613, %v718_v16 }
 0x201   :  { %v721_v20 = vmax.bf16 %v719_v17, %v717_v11 }
 0x202   :  { %v722_v19 = vmax.bf16 %v720_v18, %v718_v16 }
 0x204   :  { %890 = vmatprep.mubr.bf16.mxu1 %v722_v19 }
 0x205   :  { %891 = vmatmul.mubr.bf16.vlgmr.msra.gmra.mrb[4].mxu1 %v721_v20 }
 0x2d8   :  { %v1022_v13 = vpop.f32.mrb[4].mxu1 }
 0x2d9   :  { %v1023_v15 = vpop.f32.mrb[5].mxu1 }
 0x2da   :  { %v1024_v21 = vadd.f32 %v1023_v15, %v1022_v13  ;;  %v1025_v22 = vpop.f32.mrb[6].mxu1 }
 0x2db   :  { %v1026_v23 = vpop.f32.mrb[7].mxu1 }
 0x2dc   :  { %v893_v24 = vadd.f32 %v1024_v21, %v989_v12 }
 0x2de   :  { %898 = vst [vmem:[#allocation8] sm:$0x3] %v893_v24 }
 0x2df   :  { %1244 = shalt.err (!%p1241_p0)
}
 0x2e0   :  { %s1245_s6 = scalar_lea.hbm %s1395_s7, 32 }
 0x2e1   :  { %p1246_p1 = scmp.ne.s32.totalorder %s1395_s7, %s1245_s6  ;;  %p1249_p2 = scmp.lt.u32.totalorder %s1245_s6, %s1395_s7 }
 0x2e3   :  { %p1251_p3 = pnand %p1249_p2, %p1246_p1 }
 0x2e5   :  { %1254 = shalt.err (!%p1251_p3)
}
 0x2e6   :  { %908 = dma.vmem_to_hbm [thread:$0]  %s906_s23, 32, %s1395_s7, [#allocation4]  }
 0x2e7   :  { %1259 = dma.done.wait [#allocation4], 32  }
 0x2e8   :  { %1260 = vsyncadd [#allocation4], 4294967264 }
 0x2e9   :  { %912 = vsyncpa [#allocation3], 1 }
 0x2ea   :  { %913 = vsyncpa [#allocation6], 1 }
 0x2eb   :  { %914 = vsyncpa [#allocation4], 1 }

</bundles_post_ra>
